<compile_context>
chip_gen: v7x
topology: tpu7x:2x2x1
jax: 0.10.0
libtpu: 0.0.40
codegen_flags: <defaults>
</compile_context>

<pallas_src>
import functools
import math

import jax
import jax.numpy as jnp
from jax import lax
from jax.experimental import pallas as pl
from jax.experimental.pallas import tpu as pltpu

MiB = 1024 * 1024


# ----------------------------------------------------------------------------
# Parameter init (replicates default_init(scale=0.1) == variance_scaling
# with mode='fan_avg', distribution='uniform', in_axis=1, out_axis=0).
# ----------------------------------------------------------------------------
def default_init_jax(key, shape, scale=0.1, in_axis=1, out_axis=0,
                     dtype=jnp.float32):
    scale = 1e-10 if scale == 0 else scale
    receptive_field_size = math.prod(shape) / shape[in_axis] / shape[out_axis]
    fan_in = shape[in_axis] * receptive_field_size
    fan_out = shape[out_axis] * receptive_field_size
    denominator = (fan_in + fan_out) / 2.0
    variance = scale / denominator
    limit = math.sqrt(3.0 * variance)
    return jax.random.uniform(key, shape, dtype=dtype, minval=-limit,
                              maxval=limit)


def _round_up(x, m):
    return (x + m - 1) // m * m


def _vmem_capacity_bytes():
    """Physical VMEM of the current generation; conservative fallback (v7x)."""
    try:
        return int(pltpu.get_tpu_info().vmem_capacity_bytes)
    except Exception:
        return 64 * MiB


def _spec(shape, index_map, buffered=None):
    """BlockSpec with optional pipeline depth; falls back gracefully if this
    jax version's BlockSpec does not accept pipeline_mode."""
    if buffered is not None:
        try:
            return pl.BlockSpec(shape, index_map,
                                pipeline_mode=pl.Buffered(buffered))
        except Exception:
            pass
    return pl.BlockSpec(shape, index_map)


# ----------------------------------------------------------------------------
# Kernels
# ----------------------------------------------------------------------------
def nin_kernel(x_ref, wt_ref, b_ref, o_ref, *, use_mxu):
    """Single-pass kernel.  x_ref:(C,TS)  wt_ref:(O,C)  b_ref:(O,1)  o_ref:(O,TS)."""
    x = x_ref[...]
    wt = wt_ref[...]
    if use_mxu:
        # Contract over C on the MXU; f32 accumulation regardless of storage dtype.
        acc = lax.dot_general(wt, x, (((1,), (0,)), ((), ())),
                              preferred_element_type=jnp.float32)   # (O, TS)
    else:
        # Tiny-C path (e.g. C=4): full-lane-width VPU broadcast-FMAs in f32,
        # combined pairwise (tree) to keep the VALU dependency chain short.
        C = x.shape[0]
        terms = [wt[:, c:c + 1].astype(jnp.float32)
                 * x[c:c + 1, :].astype(jnp.float32) for c in range(C)]
        while len(terms) > 1:
            nxt = [terms[i] + terms[i + 1] for i in range(0, len(terms) - 1, 2)]
            if len(terms) % 2:
                nxt.append(terms[-1])
            terms = nxt
        acc = terms[0]
    o_ref[...] = (acc + b_ref[...].astype(jnp.float32)).astype(o_ref.dtype)


def nin_kernel_reduce(x_ref, wt_ref, b_ref, o_ref, acc_ref):
    """C-reduction kernel (grid axis 2 over C chunks, 'arbitrary').
    x_ref:(TC,TS)  wt_ref:(O,TC)  b_ref:(O,1)  o_ref:(O,TS)  acc_ref:(O,TS) f32."""
    k = pl.program_id(2)

    @pl.when(k == 0)
    def _():
        acc_ref[...] = jnp.zeros_like(acc_ref)

    acc_ref[...] += lax.dot_general(wt_ref[...], x_ref[...],
                                    (((1,), (0,)), ((), ())),
                                    preferred_element_type=jnp.float32)

    @pl.when(k == pl.num_programs(2) - 1)
    def _():
        o_ref[...] = (acc_ref[...]
                      + b_ref[...].astype(jnp.float32)).astype(o_ref.dtype)


# ----------------------------------------------------------------------------
# Wrapper
# ----------------------------------------------------------------------------
def nin_forward(x, W, b, *, ts=None, c_block=None, stream_dtype=None):
    """x: (B, C, H, W); W: (C, O); b: (O,).  Returns (B, O, H, W).

    stream_dtype: dtype used for the streamed x / W tensors and the output
      (e.g. jnp.bfloat16 to halve HBM traffic); default keeps x.dtype.
    c_block: force the C-reduction path with this C chunk (multiple of 128
      dividing C); by default it is enabled automatically only when C is very
      large and would otherwise force the spatial tile below ~512 lanes.
    """
    B, C, H, Wd = x.shape
    O = W.shape[1]
    S = H * Wd

    stream_dtype = x.dtype if stream_dtype is None else jnp.dtype(stream_dtype)
    itemsize = jnp.dtype(stream_dtype).itemsize
    sub = 16 if itemsize == 2 else 8            # sublane padding granularity
    o_pad = _round_up(O, sub)
    o_pad32 = _round_up(O, 8)

    vmem_cap = _vmem_capacity_bytes()
    budget = int(0.55 * vmem_cap)               # working-set budget for sizing
    limit_cap = min(int(0.70 * vmem_cap), 100 * MiB)

    def weight_bytes(cblk, w_buf):
        # (O, cblk) weight tile(s) + f32 (O,1) bias padded to one (8,128) tile.
        return (w_buf * o_pad * _round_up(cblk, 128) * itemsize
                + 2 * o_pad32 * 128 * 4)

    def per_lane_bytes(cblk):
        # dbl-buffered x tile + dbl-buffered out tile + f32 intermediate/acc.
        return (2 * _round_up(cblk, sub) * itemsize
                + 2 * o_pad * itemsize
                + o_pad32 * 4)

    def pick_ts(cblk, w_buf):
        avail = max(budget - weight_bytes(cblk, w_buf), 0)
        t = max(128, (avail // max(per_lane_bytes(cblk), 1)) // 128 * 128)
        return int(min(t, 32768, _round_up(S, 128)))

    # --- decide single-pass vs C-reduction path ------------------------------
    use_reduce = False
    tc = C
    if c_block is not None and c_block != C:
        if C % c_block != 0 or c_block % 128 != 0:
            raise ValueError("c_block must be a multiple of 128 dividing C")
        use_reduce, tc = True, int(c_block)
    else:
        if pick_ts(C, w_buf=1) < 512 and C >= 256 and C % 128 == 0:
            use_reduce, tc = True, 128
            for cand in sorted((d for d in range(128, C, 128) if C % d == 0),
                               reverse=True):
                if pick_ts(cand, w_buf=2) >= 1024:
                    tc = cand
                    break
    w_buf = 2 if use_reduce else 1

    if ts is None:
        ts = pick_ts(tc, w_buf)
    ts = int(ts)
    n_s = pl.cdiv(S, ts)

    # v7x megacore: keep the 'parallel' grid (B * n_s) even so neither of the
    # two TensorCores idles.  No-op when B is even or S fits one tile.
    if B % 2 == 1 and n_s % 2 == 1 and S > 128:
        t2, n2 = ts, n_s
        while n2 % 2 == 1 and t2 > 128:
            t2 -= 128
            n2 = pl.cdiv(S, t2)
        if n2 % 2 == 0:
            ts, n_s = t2, n2

    est = weight_bytes(tc, w_buf) + per_lane_bytes(tc) * ts
    vmem_limit = int(min(max(int(1.5 * est), 32 * MiB), limit_cap))

    # --- operands (reshape of contiguous NCHW: no copy) ----------------------
    x3 = x.reshape(B, C, S)
    if x3.dtype != stream_dtype:
        x3 = x3.astype(stream_dtype)
    wt = W.T.astype(stream_dtype)               # (O, C), tiny
    b2 = b.reshape(O, 1).astype(jnp.float32)

    try:
        cost = pl.CostEstimate(
            flops=2 * B * S * C * O,
            transcendentals=0,
            bytes_accessed=(B * S * (C + O) * itemsize
                            + C * O * itemsize + O * 4))
    except Exception:
        cost = None

    if use_reduce:
        n_k = C // tc
        grid = (B, n_s, n_k)
        in_specs = [
            pl.BlockSpec((pl.Squeezed(), tc, ts),
                         lambda bi, si, ki: (bi, ki, si)),
            # weight varies with ki -> keep default double-buffering
            pl.BlockSpec((O, tc), lambda bi, si, ki: (0, ki)),
            _spec((O, 1), lambda bi, si, ki: (0, 0), buffered=1),
        ]
        out_specs = pl.BlockSpec((pl.Squeezed(), O, ts),
                                 lambda bi, si, ki: (bi, 0, si))
        scratch = [pltpu.VMEM((O, ts), jnp.float32)]
        kernel = nin_kernel_reduce
        dims = ("parallel", "parallel", "arbitrary")
    else:
        grid = (B, n_s)
        in_specs = [
            pl.BlockSpec((pl.Squeezed(), C, ts), lambda bi, si: (bi, 0, si)),
            # grid-invariant weight / bias: single-buffered (VMEM saving)
            _spec((O, C), lambda bi, si: (0, 0), buffered=1),
            _spec((O, 1), lambda bi, si: (0, 0), buffered=1),
        ]
        out_specs = pl.BlockSpec((pl.Squeezed(), O, ts),
                                 lambda bi, si: (bi, 0, si))
        scratch = []
        kernel = functools.partial(nin_kernel, use_mxu=(C >= 16))
        dims = ("parallel", "parallel")

    y3 = pl.pallas_call(
        kernel,
        out_shape=jax.ShapeDtypeStruct((B, O, S), stream_dtype),
        grid=grid,
        in_specs=in_specs,
        out_specs=out_specs,
        scratch_shapes=scratch,
        compiler_params=pltpu.CompilerParams(
            dimension_semantics=dims,
            vmem_limit_bytes=vmem_limit,
        ),
        cost_estimate=cost,
    )(x3, wt, b2)

    return y3.reshape(B, O, H, Wd)   # pure reshape back to NCHW: no copy


# ----------------------------------------------------------------------------
# Reference (pure JAX) for sanity checking.
# ----------------------------------------------------------------------------
def nin_reference(x, W, b):
    return jnp.einsum('bchw,co->bohw', x, W) + b[None, :, None, None]


if __name__ == "__main__":
    key = jax.random.PRNGKey(0)
    k1, k2, k3, k4, k5, k6, k7 = jax.random.split(key, 7)

    # 1) Module demo shape (tiny-C VPU path), f32, exact check.
    B, C, H, Wd, O = 2, 4, 16, 16, 8
    x = jax.random.normal(k1, (B, C, H, Wd), dtype=jnp.float32)
    W = default_init_jax(k2, (C, O), scale=0.1)
    b = jnp.zeros((O,), dtype=jnp.float32)
    y = jax.block_until_ready(nin_forward(x, W, b))
    y_ref = nin_reference(x, W, b)
    assert y.shape == (B, O, H, Wd), y.shape
    assert jnp.allclose(y, y_ref, atol=1e-5, rtol=1e-5), \
        float(jnp.max(jnp.abs(y - y_ref)))

    # 2) MXU path (C >= 16) with a spatial extent that is NOT a multiple of 128
    #    (exercises masked partial trailing tile).
    B2, C2, H2, W2d, O2 = 1, 32, 9, 13, 16
    x2 = jax.random.normal(k3, (B2, C2, H2, W2d), dtype=jnp.float32)
    Wm = default_init_jax(k4, (C2, O2), scale=0.1)
    bm = 0.1 * jax.random.normal(k5, (O2,), dtype=jnp.float32)
    y2 = jax.block_until_ready(nin_forward(x2, Wm, bm))
    y2_ref = nin_reference(x2, Wm, bm)
    assert y2.shape == (B2, O2, H2, W2d)
    assert jnp.allclose(y2, y2_ref, atol=1e-2, rtol=1e-2), \
        float(jnp.max(jnp.abs(y2 - y2_ref)))

    # 3) bf16-streamed variant (halved HBM traffic), relaxed tolerance.
    yb = jax.block_until_ready(nin_forward(x, W, b, stream_dtype=jnp.bfloat16))
    assert yb.dtype == jnp.bfloat16
    assert jnp.allclose(yb.astype(jnp.float32), y_ref, atol=5e-2, rtol=5e-2), \
        float(jnp.max(jnp.abs(yb.astype(jnp.float32) - y_ref)))

    # 4) C-reduction path (forced small here; auto-enabled only for very large C).
    B4, C4, H4, W4d, O4 = 1, 256, 8, 16, 8
    x4 = jax.random.normal(k6, (B4, C4, H4, W4d), dtype=jnp.float32)
    W4 = default_init_jax(k7, (C4, O4), scale=0.1)
    b4 = jnp.zeros((O4,), dtype=jnp.float32)
    y4 = jax.block_until_ready(nin_forward(x4, W4, b4, c_block=128))
    y4_ref = nin_reference(x4, W4, b4)
    assert y4.shape == (B4, O4, H4, W4d)
    assert jnp.allclose(y4, y4_ref, atol=1e-2, rtol=1e-2), \
        float(jnp.max(jnp.abs(y4 - y4_ref)))

    print("KERNEL_OK")
</pallas_src>

<mosaic_0001>
module attributes {stable_mosaic.version = 11 : i64} {
  func.func @nin_kernel(%arg0: i32, %arg1: i32, %arg2: memref<1x4x256xf32, #tpu.memory_space<vmem>>, %arg3: memref<8x4xf32, #tpu.memory_space<vmem>>, %arg4: memref<8x1xf32, #tpu.memory_space<vmem>>, %arg5: memref<1x8x256xf32, #tpu.memory_space<vmem>>) attributes {dimension_semantics = [#tpu.dimension_semantics<parallel>, #tpu.dimension_semantics<parallel>], iteration_bounds = array<i64: 2, 1>, scalar_prefetch = 0 : i64, scratch_operands = 0 : i64, tpu.core_type = #tpu.core_type<tc>, window_params = [{transform_indices = @transform_0, window_bounds = array<i64: 1, 4, 256>}, {pipeline_mode = #tpu.pipeline_mode<synchronous>, transform_indices = @transform_1, window_bounds = array<i64: 8, 4>}, {pipeline_mode = #tpu.pipeline_mode<synchronous>, transform_indices = @transform_2, window_bounds = array<i64: 8, 1>}, {transform_indices = @transform_3, window_bounds = array<i64: 1, 8, 256>}]} {
    %c0 = arith.constant 0 : index
    %c0_0 = arith.constant 0 : index
    %c0_1 = arith.constant 0 : index
    %0 = vector.load %arg2[%c0, %c0_0, %c0_1] : memref<1x4x256xf32, #tpu.memory_space<vmem>>, vector<1x4x256xf32>
    %1 = vector.shape_cast %0 : vector<1x4x256xf32> to vector<4x256xf32>
    %c0_2 = arith.constant 0 : index
    %c0_3 = arith.constant 0 : index
    %2 = vector.load %arg3[%c0_2, %c0_3] : memref<8x4xf32, #tpu.memory_space<vmem>>, vector<8x4xf32>
    %3 = vector.extract_strided_slice %2 {offsets = [0, 0], sizes = [8, 1], strides = [1, 1]} : vector<8x4xf32> to vector<8x1xf32>
    %4 = vector.extract_strided_slice %1 {offsets = [0, 0], sizes = [1, 256], strides = [1, 1]} : vector<4x256xf32> to vector<1x256xf32>
    %5 = vector.broadcast %3 : vector<8x1xf32> to vector<8x256xf32>
    %6 = vector.broadcast %4 : vector<1x256xf32> to vector<8x256xf32>
    %7 = arith.mulf %5, %6 : vector<8x256xf32>
    %8 = vector.extract_strided_slice %2 {offsets = [0, 1], sizes = [8, 1], strides = [1, 1]} : vector<8x4xf32> to vector<8x1xf32>
    %9 = vector.extract_strided_slice %1 {offsets = [1, 0], sizes = [1, 256], strides = [1, 1]} : vector<4x256xf32> to vector<1x256xf32>
    %10 = vector.broadcast %8 : vector<8x1xf32> to vector<8x256xf32>
    %11 = vector.broadcast %9 : vector<1x256xf32> to vector<8x256xf32>
    %12 = arith.mulf %10, %11 : vector<8x256xf32>
    %13 = vector.extract_strided_slice %2 {offsets = [0, 2], sizes = [8, 1], strides = [1, 1]} : vector<8x4xf32> to vector<8x1xf32>
    %14 = vector.extract_strided_slice %1 {offsets = [2, 0], sizes = [1, 256], strides = [1, 1]} : vector<4x256xf32> to vector<1x256xf32>
    %15 = vector.broadcast %13 : vector<8x1xf32> to vector<8x256xf32>
    %16 = vector.broadcast %14 : vector<1x256xf32> to vector<8x256xf32>
    %17 = arith.mulf %15, %16 : vector<8x256xf32>
    %18 = vector.extract_strided_slice %2 {offsets = [0, 3], sizes = [8, 1], strides = [1, 1]} : vector<8x4xf32> to vector<8x1xf32>
    %19 = vector.extract_strided_slice %1 {offsets = [3, 0], sizes = [1, 256], strides = [1, 1]} : vector<4x256xf32> to vector<1x256xf32>
    %20 = vector.broadcast %18 : vector<8x1xf32> to vector<8x256xf32>
    %21 = vector.broadcast %19 : vector<1x256xf32> to vector<8x256xf32>
    %22 = arith.mulf %20, %21 : vector<8x256xf32>
    %23 = arith.addf %7, %12 : vector<8x256xf32>
    %24 = arith.addf %17, %22 : vector<8x256xf32>
    %25 = arith.addf %23, %24 : vector<8x256xf32>
    %c0_4 = arith.constant 0 : index
    %c0_5 = arith.constant 0 : index
    %26 = vector.load %arg4[%c0_4, %c0_5] : memref<8x1xf32, #tpu.memory_space<vmem>>, vector<8x1xf32>
    %27 = vector.broadcast %26 : vector<8x1xf32> to vector<8x256xf32>
    %28 = arith.addf %25, %27 : vector<8x256xf32>
    %c0_6 = arith.constant 0 : index
    %c0_7 = arith.constant 0 : index
    %c0_8 = arith.constant 0 : index
    %29 = vector.load %arg5[%c0_6, %c0_7, %c0_8] : memref<1x8x256xf32, #tpu.memory_space<vmem>>, vector<1x8x256xf32>
    %30 = vector.shape_cast %29 : vector<1x8x256xf32> to vector<8x256xf32>
    %31 = vector.shape_cast %28 : vector<8x256xf32> to vector<1x8x256xf32>
    tpu.vector_store %arg5[%c0_6, %c0_7, %c0_8], %31 {strides = array<i32>} : memref<1x8x256xf32, #tpu.memory_space<vmem>>, vector<1x8x256xf32>,
    return
  }
  func.func @transform_0(%arg0: i32, %arg1: i32) -> (i32, i32, i32) {
    %c0_i32 = arith.constant 0 : i32
    %c0_i32_0 = arith.constant 0 : i32
    return %arg0, %c0_i32, %arg1 : i32, i32, i32
  }
  func.func @transform_1(%arg0: i32, %arg1: i32) -> (i32, i32) {
    %c0_i32 = arith.constant 0 : i32
    %c0_i32_0 = arith.constant 0 : i32
    %c0_i32_1 = arith.constant 0 : i32
    return %c0_i32, %c0_i32_0 : i32, i32
  }
  func.func @transform_2(%arg0: i32, %arg1: i32) -> (i32, i32) {
    %c0_i32 = arith.constant 0 : i32
    %c0_i32_0 = arith.constant 0 : i32
    %c0_i32_1 = arith.constant 0 : i32
    return %c0_i32, %c0_i32_0 : i32, i32
  }
  func.func @transform_3(%arg0: i32, %arg1: i32) -> (i32, i32, i32) {
    %c0_i32 = arith.constant 0 : i32
    %c0_i32_0 = arith.constant 0 : i32
    return %arg0, %c0_i32, %arg1 : i32, i32, i32
  }
}

</mosaic_0001>

<bundles_post_ra>
// kernel: tpu_custom_call.1
= control target key start
LH: loop header
LB: loop body
LE: loop exit
PB: predicated region body
PF: predicated region fallthrough
CT: control target
= control target key end

     0   :  { %8 = vsyncpa [#allocation3], 0  ;;  %s716_s0 = inlined_call_operand.vmem [shape: f32[2,4,256], index: 0, kind: input, shape index: {}]   ;;  %s717_s1 = inlined_call_operand.vmem [shape: f32[8,4], index: 1, kind: input, shape index: {}]   ;;  %s718_s2 = inlined_call_operand.vmem [shape: f32[8,1], index: 2, kind: input, shape index: {}]   ;;  %s719_s3 = inlined_call_operand.hbm [shape: f32[2,8,256], index: 3, kind: output, shape index: {}]  }
   0x1   :  { %10 = vsyncpa [#allocation3 + $0x1], 0  ;;  %s594_s12 = smov 0   ;;  %s596_s13 = smov 0  }
   0x2   :  { %s598_s14 = smov 0   ;;  %s600_s15 = smov 0  }
   0x3   :  { %s602_s16 = smov 0   ;;  %s604_s17 = smov 0  }
   0x4 LB: > { %s409_s18 = sadd.s32 4294967295, %s567_s17   ;;  %s410_s19 = sadd.s32 4294967294, %s567_s17   ;;  %s567_s17 = sphi %s604_s17, %s16_s17   ;;  %s563_s16 = sphi %s602_s16, %s726_s16   ;;  %s559_s15 = sphi %s600_s15, %s725_s15   ;;  %s555_s14 = sphi %s598_s14, %s724_s14   ;;  %s551_s13 = sphi %s596_s13, %s723_s13   ;;  %s547_s12 = sphi %s594_s12, %s722_s12  }
   0x5   : > { %s28_s20 = sadd.s32 1, %s563_s16  ;;  %s107_s21 = sadd.s32 1, %s555_s14 }
   0x6   : > { %p30_p0 = scmp.ge.s32.totalorder %s28_s20, 2  ;;  %p117_p1 = scmp.ne.s32.totalorder %s555_s14, %s551_s13 }
   0x7   : > { %p118_p2 = scmp.eq.s32.totalorder %s409_s18, 1  ;;  %p123_p3 = scmp.ne.s32.totalorder %s551_s13, %s547_s12 }
   0x8   : > { %s728_s20 = smov (%p30_p0, %s28_s20), 0  ;;  %p124_p5 = scmp.eq.s32.totalorder %s410_s19, 1 }
   0x9   : > { %p634_p4 = por %p118_p2, %p117_p1  ;;  %s102_s23 = ssub.s32 %s563_s16, %s728_s20 }
   0xa   : > { %p413_p6 = scmp.ge.s32.totalorder %s567_s17, 1  ;;  %p105_p7 = scmp.eq.s32.totalorder %s102_s23, 0 }
   0xb   : > { %p641_p8 = por %p124_p5, %p123_p3  ;;  %p161_p9 = scmp.lt.s32.totalorder %s567_s17, 3 }
   0xc   : > { %s647_s25 = scalar_select %p105_p7, %s555_s14, %s107_s21  }
   0xd   : > { %p162_p10 = pnand %p413_p6, %p161_p9 }
   0xe   : > { %v201_v0 = vld [vmem:[%s717_s1] sm:$0xff] (!%p162_p10)  ;;  %v569_v1 = vmov (!%p162_p10), 2   ;;  %v570_v2 = vmov (!%p162_p10), 0   ;;  %v571_v3 = vmov (!%p162_p10), 3   ;;  %v572_v4 = vmov (!%p162_p10), 1   ;;  %p190_p11 = scmp.lt.s32.totalorder (!%p162_p10), %s559_s15, 1 }
   0xf   : > { %165 = sbr.rel (%p162_p10) target bundleno = 171 (0xab), region = 32  ;;  %485 = vset.pattern.permute.xlu1 (!%p162_p10), %v569_v1  ;;  %483 = vset.pattern.permute.xlu0 (!%p162_p10), %v570_v2  ;;  %v306_v5 = vld [vmem:[%s718_s2] sm:$0xff] (!%p162_p10)  ;;  %v208_v6 = vlaneseq (!%p162_p10)  ;;  %s186_s8 = sand.u32 (!%p162_p10), 1, %s551_s13  }
  0x10   : > { %253 = vperm.xlu1 (!%p162_p10), %485, %v201_v0   ;;  %204 = vperm.xlu0 (!%p162_p10), %483, %v201_v0   ;;  %s414_s9 = sshll.u32 (!%p162_p10), %s186_s8, 4  ;;  %s423_s10 = sshll.u32 (!%p162_p10), %s559_s15, 8 }
  0x11   : > { %v209_v7 = vshrl.u32 (!%p162_p10), %v208_v6, 7  ;;  %s188_s11 = scalar_lea.vmem (!%p162_p10), [#allocation2], %s414_s9  ;;  %s667_s23 = scalar_lea.hbm (!%p162_p10), %s719_s3, %s423_s10 }
  0x12   : > { %s333_s18 = sshll.u32 (!%p162_p10), %s188_s11, 4  ;;  %s573_s27 = smov (!%p162_p10), [#allocation2]   ;;  %s669_s18 = int_to_ptr.vmem [resolvable:$true] %s333_s18 }
  0x13   : > { %v258_v8 = vsub.s32 (!%p162_p10), 2, %v209_v7  ;;  %v262_v9 = vsub.s32 (!%p162_p10), 6, %v209_v7  ;;  %v210_v10 = vsub.s32 (!%p162_p10), 0, %v209_v7  ;;  %v214_v11 = vsub.s32 (!%p162_p10), 4, %v209_v7  ;;  %s489_s26 = scalar_lea.vmem (!%p162_p10), %s669_s18, 256  ;;  %s493_s28 = sshll.u32 (!%p162_p10), %s573_s27, 4  ;;  %s494_s28 = int_to_ptr.vmem [resolvable:$false] %s493_s28 }
  0x14   : > { %486 = vset.pattern.permute.xlu1 (!%p162_p10), %v571_v3  ;;  %484 = vset.pattern.permute.xlu0 (!%p162_p10), %v572_v4  ;;  %v282_v13 = vsub.s32 (!%p162_p10), 3, %v209_v7  ;;  %v286_v14 = vsub.s32 (!%p162_p10), 7, %v209_v7  ;;  %v234_v15 = vsub.s32 (!%p162_p10), 1, %v209_v7  ;;  %v238_v16 = vsub.s32 (!%p162_p10), 5, %v209_v7  ;;  %p490_p12 = scmp.ne.s32.totalorder (!%p162_p10), %s669_s18, %s489_s26  ;;  %s495_s29 = scalar_lea.vmem (!%p162_p10), %s494_s28, 512 }
  0x15   : > { %277 = vperm.xlu1 (!%p162_p10), %486, %v201_v0   ;;  %229 = vperm.xlu0 (!%p162_p10), %484, %v201_v0   ;;  %p496_p1 = scmp.lt.s32.totalorder (!%p162_p10), %s669_s18, %s494_s28  ;;  %p497_p2 = scmp.lt.s32.totalorder (!%p162_p10), %s495_s29, %s489_s26 }
  0x16   : > { %s191_s30 = scalar_select %p190_p11, %s559_s15, 1 }
  0x17   : > { %s317_s15 = scalar_lea.sflag [#allocation3], %s186_s8  ;;  %p491_p13 = pnand %p490_p12, %p634_p4 }
  0x18   : > { %s422_s4 = sshll.u32 %s191_s30, 3  ;;  %p498_p3 = por %p497_p2, %p496_p1 }
  0x19   : > { %487 = vset.pattern.permute.xlu1 %v570_v2  ;;  %488 = vset.pattern.permute.xlu0 %v570_v2  ;;  %s197_s7 = scalar_lea.vmem %s716_s0, %s422_s4  ;;  %p492_p0 = pneg %p491_p13 }
  0x1a   : > { %309 = vperm.xlu1 %487, %v306_v5   ;;  %v200_v12 = vld [vmem:[%s197_s7] sm:$0xff] }
  0x1b   : > { %v259_v17 = vrot.slane %v200_v12, %v258_v8  ;;  %v263_v18 = vrot.slane %v200_v12, %v262_v9  ;;  %v211_v19 = vrot.slane %v200_v12, %v210_v10  ;;  %v215_v20 = vrot.slane %v200_v12, %v214_v11  ;;  %p499_p5 = pnand %p498_p3, %p492_p0 }
  0x1c   : > { %v283_v21 = vrot.slane %v200_v12, %v282_v13  ;;  %v287_v22 = vrot.slane %v200_v12, %v286_v14  ;;  %v235_v23 = vrot.slane %v200_v12, %v234_v15  ;;  %v239_v24 = vrot.slane %v200_v12, %v238_v16 }
  0x1d   : > { %v269_v27 = vrot.slane %v259_v17, %v258_v8  ;;  %v273_v28 = vrot.slane %v263_v18, %v258_v8  ;;  %v221_v29 = vrot.slane %v211_v19, %v210_v10  ;;  %v225_v30 = vrot.slane %v215_v20, %v210_v10 }
  0x1e   : > { %v293_v31 = vrot.slane %v283_v21, %v282_v13  ;;  %v297_v32 = vrot.slane %v287_v22, %v282_v13  ;;  %v245_v33 = vrot.slane %v235_v23, %v234_v15  ;;  %v249_v34 = vrot.slane %v239_v24, %v234_v15 }
  0x8f   : > { %v254_v25 = vpop.permute.xlu1 %253  ;;  %v205_v26 = vpop.permute.xlu0 %204 }
  0x90   : > { %v274_v35 = vmul.f32 %v269_v27, %v254_v25  ;;  %v275_v36 = vmul.f32 %v273_v28, %v254_v25  ;;  %v226_v37 = vmul.f32 %v221_v29, %v205_v26  ;;  %v227_v38 = vmul.f32 %v225_v30, %v205_v26 }
  0x94   : > { %v278_v39 = vpop.permute.xlu1 %277  ;;  %v230_v40 = vpop.permute.xlu0 %229 }
  0x95   : > { %v298_v41 = vmul.f32 %v293_v31, %v278_v39  ;;  %v299_v42 = vmul.f32 %v297_v32, %v278_v39  ;;  %v250_v43 = vmul.f32 %v245_v33, %v230_v40  ;;  %v251_v44 = vmul.f32 %v249_v34, %v230_v40 }
  0x97   : > { %v302_v45 = vadd.f32 %v298_v41, %v274_v35  ;;  %v303_v46 = vadd.f32 %v299_v42, %v275_v36  ;;  %v300_v47 = vadd.f32 %v250_v43, %v226_v37  ;;  %v301_v48 = vadd.f32 %v251_v44, %v227_v38 }
  0x99   : > { %v310_v49 = vpop.permute.xlu1 %309  ;;  %v304_v50 = vadd.f32 %v302_v45, %v300_v47  ;;  %v305_v51 = vadd.f32 %v303_v46, %v301_v48 }
  0x9b   : > { %v312_v52 = vadd.f32 %v310_v49, %v304_v50  ;;  %v313_v53 = vadd.f32 %v310_v49, %v305_v51 }
  0x9d   : > { %314 = vst [vmem:[%s188_s11] sm:$0xff] %v312_v52  ;;  %315 = vst [vmem:[%s188_s11 + $0x8] sm:$0xff] %v313_v53 }
  0x9e   : > { %502 = shalt.err (!%p499_p5)
}
  0x9f   : > { %s503_s30 = scalar_lea.hbm %s667_s23, 256  ;;  %s507_s6 = scalar_lea.hbm %s719_s3, 512 }
  0xa0   : > { %p504_p6 = scmp.ne.s32.totalorder %s667_s23, %s503_s30  ;;  %p508_p10 = scmp.lt.u32.totalorder %s667_s23, %s719_s3 }
  0xa1   : > { %p509_p11 = scmp.lt.u32.totalorder %s507_s6, %s503_s30  ;;  %p511_p13 = scmp.lt.u32.totalorder %s503_s30, %s667_s23 }
  0xa2   : > { %p505_p7 = pnand %p504_p6, %p634_p4 }
  0xa3   : > { %p510_p12 = por %p509_p11, %p508_p10 }
  0xa4   : > { %p506_p9 = pneg %p505_p7 }
  0xa5   : > { %p512_p0 = por %p511_p13, %p510_p12 }
  0xa7   : > { %p513_p1 = pnand %p512_p0, %p506_p9 }
  0xa9   : > { %516 = shalt.err (!%p513_p1)
}
  0xaa   : > { %424 = dma.vmem_to_hbm [thread:$0]  (%p634_p4), %s669_s18, 256, %s667_s23, %s317_s15  }
  0xab PF: > { %p430_p2 = scmp.ge.s32.totalorder %s567_s17, 2  ;;  %s345_s9 = sand.u32 1, %s547_s12  }
  0xac   : > { %s346_s10 = scalar_lea.sflag [#allocation3], %s345_s9 }
  0xad   : > { %p427_p3 = pnand %p430_p2, %p641_p8 }
  0xaf   : > { %542 = dma.done.wait (!%p427_p3), %s346_s10, 256  }
  0xb0   : > { %544 = vsyncadd (!%p427_p3), %s346_s10, 4294967040  ;;  %s16_s17 = sadd.s32 1, %s567_s17   ;;  %s722_s12 = smov %s551_s13 }
  0xb1   : > { %p13_p5 = scmp.ge.s32.totalorder %s16_s17, 4   ;;  %s723_s13 = smov %s555_s14 }
  0xb2   : > { %s724_s14 = smov %s647_s25  ;;  %s725_s15 = smov %s563_s16 }
  0xb3   : > { %s726_s16 = smov %s728_s20  ;;  %15 = sbr.rel (!%p13_p5) target bundleno = 4 (0x4), region = 67 }
  0xba   :  { %351 = vsyncpa [#allocation3], 1 }
  0xbb   :  { %353 = vsyncpa [#allocation3 + $0x1], 1 }

</bundles_post_ra>
